<compile_context>
chip_gen: v6e
topology: v6e:2x2x1
jax: 0.10.0
libtpu: 0.0.40
codegen_flags: <defaults>
</compile_context>

<pallas_src>
import functools

import jax
import jax.numpy as jnp
from jax.experimental import pallas as pl
from jax.experimental.pallas import tpu as pltpu

IN_FEATURES = 28 * 28   # 784 (compiler pads K to 896 = 7*128 internally)
HIDDEN = 256


def _leaky_relu(x, slope=0.01):
    # PyTorch nn.LeakyReLU() default negative_slope = 0.01
    return jnp.where(x > 0, x, slope * x)


def _round_up(n, m):
    return ((n + m - 1) // m) * m


def discriminator_kernel(x_ref, w1_ref, b1_ref, w2_ref, b2_ref, w3_ref, b3_ref,
                         o_ref):
    """One batch tile: (TB, 784) -> (TB, 256) -> (TB, 256) -> (1, 1, TB)."""
    # fc1: bf16 MXU inputs, f32 accumulation; bias + LeakyReLU in f32 (VPU).
    h1 = jnp.dot(x_ref[...].astype(jnp.bfloat16), w1_ref[...],
                 preferred_element_type=jnp.float32)
    h1 = _leaky_relu(h1 + b1_ref[...])

    # fc2: bf16 MXU inputs, f32 accumulation.
    h2 = jnp.dot(h1.astype(jnp.bfloat16), w2_ref[...],
                 preferred_element_type=jnp.float32)
    h2 = _leaky_relu(h2 + b2_ref[...])

    # out layer: N=1, so skip the MXU — VPU multiply + XLU lane reduce,
    # bias + sigmoid in f32, result laid out lane-dense as (1, 1, TB).
    logits = jnp.sum(h2 * w3_ref[...], axis=-1)        # (TB,)
    logits = logits[None, :] + b3_ref[...]             # (1, TB) + (1, 1)
    o_ref[...] = jax.nn.sigmoid(logits)[None, ...].astype(o_ref.dtype)


@functools.partial(jax.jit, static_argnames=("block_b",))
def discriminator_forward(x, params, block_b=1024):
    """x: (B, 784) float32. Returns (B, 1) float32 in (0, 1)."""
    w1, b1, w2, b2, w3, b3 = params
    B = x.shape[0]

    # Batch tile: multiple of 8 (sublanes), capped at block_b.
    tb = min(block_b, _round_up(B, 8))
    grid_b = pl.cdiv(B, tb)
    b_pad = grid_b * tb
    if b_pad != B:
        x = jnp.pad(x, ((0, b_pad - B), (0, 0)))   # zero rows, sliced off below

    # MXU operands in bf16 (resident in VMEM); final-layer weight as an f32 row.
    w1b = w1.astype(jnp.bfloat16)
    w2b = w2.astype(jnp.bfloat16)
    w3r = w3.reshape(1, HIDDEN).astype(jnp.float32)

    const = lambda a: pl.BlockSpec(a.shape, lambda i: (0,) * a.ndim)

    out = pl.pallas_call(
        discriminator_kernel,
        out_shape=jax.ShapeDtypeStruct((grid_b, 1, tb), jnp.float32),
        grid_spec=pltpu.PrefetchScalarGridSpec(
            num_scalar_prefetch=0,
            grid=(grid_b,),
            in_specs=[
                pl.BlockSpec((tb, IN_FEATURES), lambda i: (i, 0)),  # x, tiled
                const(w1b), const(b1),                              # resident
                const(w2b), const(b2),
                const(w3r), const(b3),
            ],
            out_specs=pl.BlockSpec((1, 1, tb), lambda i: (i, 0, 0)),
        ),
        compiler_params=pltpu.CompilerParams(
            dimension_semantics=("parallel",),          # megacore on v7x
            vmem_limit_bytes=32 * 1024 * 1024,
        ),
    )(x, w1b, b1, w2b, b2, w3r, b3)

    # Lane-dense (grid_b, 1, tb) slab -> (B, 1).
    return out.reshape(-1)[:B].reshape(B, 1)


def init_params(key):
    """PyTorch nn.Linear default init: U(-k, k), k = 1/sqrt(fan_in)."""
    def linear(key, fan_in, fan_out):
        kw, kb = jax.random.split(key)
        bound = 1.0 / jnp.sqrt(fan_in)
        # Stored as (in, out): transpose of PyTorch's (out, in) .weight.
        w = jax.random.uniform(kw, (fan_in, fan_out), jnp.float32, -bound, bound)
        b = jax.random.uniform(kb, (1, fan_out), jnp.float32, -bound, bound)
        return w, b

    k1, k2, k3 = jax.random.split(key, 3)
    w1, b1 = linear(k1, IN_FEATURES, HIDDEN)
    w2, b2 = linear(k2, HIDDEN, HIDDEN)
    w3, b3 = linear(k3, HIDDEN, 1)
    return (w1, b1, w2, b2, w3, b3)


def _reference_forward_f32(x, params):
    """Pure-f32 reference — matches the PyTorch module exactly."""
    w1, b1, w2, b2, w3, b3 = params
    h = _leaky_relu(x @ w1 + b1)
    h = _leaky_relu(h @ w2 + b2)
    return jax.nn.sigmoid(h @ w3 + b3)


def _reference_forward_mixed(x, params):
    """Reference using the same bf16-input / f32-accumulate dots as the kernel."""
    w1, b1, w2, b2, w3, b3 = params
    h1 = _leaky_relu(jnp.dot(x.astype(jnp.bfloat16), w1.astype(jnp.bfloat16),
                             preferred_element_type=jnp.float32) + b1)
    h2 = _leaky_relu(jnp.dot(h1.astype(jnp.bfloat16), w2.astype(jnp.bfloat16),
                             preferred_element_type=jnp.float32) + b2)
    logits = jnp.sum(h2 * w3.reshape(1, -1), axis=-1, keepdims=True) + b3
    return jax.nn.sigmoid(logits)


if __name__ == "__main__":
    key = jax.random.PRNGKey(0)
    kx, kp = jax.random.split(key)

    B = 8  # small demo batch
    x = jax.random.normal(kx, (B, IN_FEATURES), dtype=jnp.float32)
    params = init_params(kp)

    out = discriminator_forward(x, params)
    out = jax.block_until_ready(out)

    assert out.shape == (B, 1), out.shape
    assert bool(jnp.all(jnp.isfinite(out)))

    ref_mixed = _reference_forward_mixed(x, params)
    ref_f32 = _reference_forward_f32(x, params)
    assert jnp.allclose(out, ref_mixed, atol=1e-4, rtol=1e-4), (
        float(jnp.max(jnp.abs(out - ref_mixed))))
    # Loose check against the exact f32 PyTorch semantics (bf16 MXU inputs).
    assert jnp.allclose(out, ref_f32, atol=2e-2, rtol=2e-2), (
        float(jnp.max(jnp.abs(out - ref_f32))))

    print("KERNEL_OK")
</pallas_src>

<mosaic_0001>
module attributes {stable_mosaic.version = 11 : i64} {
  func.func @discriminator_kernel(%arg0: i32, %arg1: memref<8x784xf32, #tpu.memory_space<vmem>>, %arg2: memref<784x256xbf16, #tpu.memory_space<vmem>>, %arg3: memref<1x256xf32, #tpu.memory_space<vmem>>, %arg4: memref<256x256xbf16, #tpu.memory_space<vmem>>, %arg5: memref<1x256xf32, #tpu.memory_space<vmem>>, %arg6: memref<1x256xf32, #tpu.memory_space<vmem>>, %arg7: memref<1x1xf32, #tpu.memory_space<vmem>>, %arg8: memref<1x1x8xf32, #tpu.memory_space<vmem>>) attributes {dimension_semantics = [#tpu.dimension_semantics<parallel>], iteration_bounds = array<i64: 1>, scalar_prefetch = 0 : i64, scratch_operands = 0 : i64, tpu.core_type = #tpu.core_type<tc>, window_params = [{transform_indices = @transform_0, window_bounds = array<i64: 8, 784>}, {pipeline_mode = #tpu.pipeline_mode<synchronous>, transform_indices = @transform_1, window_bounds = array<i64: 784, 256>}, {pipeline_mode = #tpu.pipeline_mode<synchronous>, transform_indices = @transform_2, window_bounds = array<i64: 1, 256>}, {pipeline_mode = #tpu.pipeline_mode<synchronous>, transform_indices = @transform_3, window_bounds = array<i64: 256, 256>}, {pipeline_mode = #tpu.pipeline_mode<synchronous>, transform_indices = @transform_4, window_bounds = array<i64: 1, 256>}, {pipeline_mode = #tpu.pipeline_mode<synchronous>, transform_indices = @transform_5, window_bounds = array<i64: 1, 256>}, {pipeline_mode = #tpu.pipeline_mode<synchronous>, transform_indices = @transform_6, window_bounds = array<i64: 1, 1>}, {transform_indices = @transform_7, window_bounds = array<i64: 1, 1, 8>}]} {
    %c0 = arith.constant 0 : index
    %c0_0 = arith.constant 0 : index
    %0 = vector.load %arg1[%c0, %c0_0] : memref<8x784xf32, #tpu.memory_space<vmem>>, vector<8x784xf32>
    %1 = arith.truncf %0 : vector<8x784xf32> to vector<8x784xbf16>
    %c0_1 = arith.constant 0 : index
    %c0_2 = arith.constant 0 : index
    %2 = vector.load %arg2[%c0_1, %c0_2] : memref<784x256xbf16, #tpu.memory_space<vmem>>, vector<784x256xbf16>
    %cst = arith.constant dense<0.000000e+00> : vector<8x256xf32>
    %3 = tpu.matmul %1, %2, %cst {dimension_numbers = #tpu.dot_dimension_numbers<[1], [0], [0], [1], [0, 0, 1, 1], [], []>} : vector<8x784xbf16>, vector<784x256xbf16>, vector<8x256xf32> -> vector<8x256xf32>
    %c0_3 = arith.constant 0 : index
    %c0_4 = arith.constant 0 : index
    %4 = vector.load %arg3[%c0_3, %c0_4] : memref<1x256xf32, #tpu.memory_space<vmem>>, vector<1x256xf32>
    %5 = vector.broadcast %4 : vector<1x256xf32> to vector<8x256xf32>
    %6 = arith.addf %3, %5 : vector<8x256xf32>
    %cst_5 = arith.constant 0.000000e+00 : f32
    %7 = vector.broadcast %cst_5 : f32 to vector<8x256xf32>
    %8 = arith.cmpf ogt, %6, %7 : vector<8x256xf32>
    %cst_6 = arith.constant 0.00999999977 : f32
    %9 = vector.broadcast %cst_6 : f32 to vector<8x256xf32>
    %10 = arith.mulf %9, %6 : vector<8x256xf32>
    %11 = arith.select %8, %6, %10 : vector<8x256xi1>, vector<8x256xf32>
    %12 = arith.truncf %11 : vector<8x256xf32> to vector<8x256xbf16>
    %c0_7 = arith.constant 0 : index
    %c0_8 = arith.constant 0 : index
    %13 = vector.load %arg4[%c0_7, %c0_8] : memref<256x256xbf16, #tpu.memory_space<vmem>>, vector<256x256xbf16>
    %cst_9 = arith.constant dense<0.000000e+00> : vector<8x256xf32>
    %14 = tpu.matmul %12, %13, %cst_9 {dimension_numbers = #tpu.dot_dimension_numbers<[1], [0], [0], [1], [0, 0, 1, 1], [], []>} : vector<8x256xbf16>, vector<256x256xbf16>, vector<8x256xf32> -> vector<8x256xf32>
    %c0_10 = arith.constant 0 : index
    %c0_11 = arith.constant 0 : index
    %15 = vector.load %arg5[%c0_10, %c0_11] : memref<1x256xf32, #tpu.memory_space<vmem>>, vector<1x256xf32>
    %16 = vector.broadcast %15 : vector<1x256xf32> to vector<8x256xf32>
    %17 = arith.addf %14, %16 : vector<8x256xf32>
    %cst_12 = arith.constant 0.000000e+00 : f32
    %18 = vector.broadcast %cst_12 : f32 to vector<8x256xf32>
    %19 = arith.cmpf ogt, %17, %18 : vector<8x256xf32>
    %cst_13 = arith.constant 0.00999999977 : f32
    %20 = vector.broadcast %cst_13 : f32 to vector<8x256xf32>
    %21 = arith.mulf %20, %17 : vector<8x256xf32>
    %22 = arith.select %19, %17, %21 : vector<8x256xi1>, vector<8x256xf32>
    %c0_14 = arith.constant 0 : index
    %c0_15 = arith.constant 0 : index
    %23 = vector.load %arg6[%c0_14, %c0_15] : memref<1x256xf32, #tpu.memory_space<vmem>>, vector<1x256xf32>
    %24 = vector.broadcast %23 : vector<1x256xf32> to vector<8x256xf32>
    %25 = arith.mulf %22, %24 : vector<8x256xf32>
    %cst_16 = arith.constant dense<0.000000e+00> : vector<8xf32>
    %26 = vector.multi_reduction <add>, %25, %cst_16 [1] : vector<8x256xf32> to vector<8xf32>
    %27 = vector.shape_cast %26 : vector<8xf32> to vector<1x8xf32>
    %c0_17 = arith.constant 0 : index
    %c0_18 = arith.constant 0 : index
    %28 = vector.load %arg7[%c0_17, %c0_18] : memref<1x1xf32, #tpu.memory_space<vmem>>, vector<1x1xf32>
    %29 = vector.broadcast %28 : vector<1x1xf32> to vector<1x8xf32>
    %30 = arith.addf %27, %29 : vector<1x8xf32>
    %31 = arith.negf %30 : vector<1x8xf32>
    %32 = math.exp %31 : vector<1x8xf32>
    %cst_19 = arith.constant 1.000000e+00 : f32
    %33 = vector.broadcast %cst_19 : f32 to vector<1x8xf32>
    %34 = arith.addf %33, %32 : vector<1x8xf32>
    %35 = arith.divf %33, %34 : vector<1x8xf32>
    %36 = vector.shape_cast %35 : vector<1x8xf32> to vector<1x1x8xf32>
    %c0_20 = arith.constant 0 : index
    %c0_21 = arith.constant 0 : index
    %c0_22 = arith.constant 0 : index
    %37 = vector.load %arg8[%c0_20, %c0_21, %c0_22] : memref<1x1x8xf32, #tpu.memory_space<vmem>>, vector<1x1x8xf32>
    tpu.vector_store %arg8[%c0_20, %c0_21, %c0_22], %36 {strides = array<i32>} : memref<1x1x8xf32, #tpu.memory_space<vmem>>, vector<1x1x8xf32>,
    return
  }
  func.func @transform_0(%arg0: i32) -> (i32, i32) {
    %c0_i32 = arith.constant 0 : i32
    %c0_i32_0 = arith.constant 0 : i32
    return %arg0, %c0_i32 : i32, i32
  }
  func.func @transform_1(%arg0: i32) -> (i32, i32) {
    %c0_i32 = arith.constant 0 : i32
    %c0_i32_0 = arith.constant 0 : i32
    %c0_i32_1 = arith.constant 0 : i32
    return %c0_i32, %c0_i32_0 : i32, i32
  }
  func.func @transform_2(%arg0: i32) -> (i32, i32) {
    %c0_i32 = arith.constant 0 : i32
    %c0_i32_0 = arith.constant 0 : i32
    %c0_i32_1 = arith.constant 0 : i32
    return %c0_i32, %c0_i32_0 : i32, i32
  }
  func.func @transform_3(%arg0: i32) -> (i32, i32) {
    %c0_i32 = arith.constant 0 : i32
    %c0_i32_0 = arith.constant 0 : i32
    %c0_i32_1 = arith.constant 0 : i32
    return %c0_i32, %c0_i32_0 : i32, i32
  }
  func.func @transform_4(%arg0: i32) -> (i32, i32) {
    %c0_i32 = arith.constant 0 : i32
    %c0_i32_0 = arith.constant 0 : i32
    %c0_i32_1 = arith.constant 0 : i32
    return %c0_i32, %c0_i32_0 : i32, i32
  }
  func.func @transform_5(%arg0: i32) -> (i32, i32) {
    %c0_i32 = arith.constant 0 : i32
    %c0_i32_0 = arith.constant 0 : i32
    %c0_i32_1 = arith.constant 0 : i32
    return %c0_i32, %c0_i32_0 : i32, i32
  }
  func.func @transform_6(%arg0: i32) -> (i32, i32) {
    %c0_i32 = arith.constant 0 : i32
    %c0_i32_0 = arith.constant 0 : i32
    %c0_i32_1 = arith.constant 0 : i32
    return %c0_i32, %c0_i32_0 : i32, i32
  }
  func.func @transform_7(%arg0: i32) -> (i32, i32, i32) {
    %c0_i32 = arith.constant 0 : i32
    %c0_i32_0 = arith.constant 0 : i32
    %c0_i32_1 = arith.constant 0 : i32
    return %arg0, %c0_i32, %c0_i32_0 : i32, i32, i32
  }
}

</mosaic_0001>

<bundles_post_ra>
// kernel: discriminator_forward.1
= control target key start
LH: loop header
LB: loop body
LE: loop exit
PB: predicated region body
PF: predicated region fallthrough
CT: control target
= control target key end

     0   :  { %s1960_s0 = inlined_call_operand.vmem [shape: f32[8,784], index: 0, kind: input, shape index: {}]   ;;  %s1961_s1 = inlined_call_operand.vmem [shape: bf16[784,256], index: 1, kind: input, shape index: {}]   ;;  %s1962_s2 = inlined_call_operand.vmem [shape: f32[1,256], index: 2, kind: input, shape index: {}]   ;;  %s1963_s3 = inlined_call_operand.vmem [shape: bf16[256,256], index: 3, kind: input, shape index: {}]   ;;  %s1964_s4 = inlined_call_operand.vmem [shape: f32[1,256], index: 4, kind: input, shape index: {}]   ;;  %s1965_s5 = inlined_call_operand.vmem [shape: f32[1,256], index: 5, kind: input, shape index: {}]   ;;  %s1966_s6 = inlined_call_operand.<no memory space> [shape: f32[1,1], index: 6, kind: input, shape index: {}]   ;;  %s1967_s7 = inlined_call_operand.hbm [shape: f32[1,1,8], index: 7, kind: output, shape index: {}]  }
   0x1   :  { %v12_v0 = vstv %s1966_s6 }
   0x2   :  { %13 = vst [vmem:[#allocation2] sm:$0x1] %v12_v0 }
   0x3   :  { %v1264_v1 = vld [vmem:[%s1961_s1 + $0x74] ss:$8 sps:$4 sm:$0xff]   ;;  %v1266_v2 = vld [vmem:[%s1961_s1 + $0x70] ss:$8 sps:$4 sm:$0xff]   ;;  %v1485_v3 = vmov 0   ;;  %v31_v48 = vld [vmem:[%s1960_s0 + $0x8] sm:$0xff] }
   0x4   :  { %1263 = vset.pattern.permute.xlu0 %v1485_v3  ;;  %648 = vmatprep.subr.bf16.mxu0 %v1264_v1  ;;  %v1267_v4 = vld [vmem:[%s1961_s1 + $0x174] ss:$8 sps:$4 sm:$0xff]   ;;  %v1269_v5 = vld [vmem:[%s1961_s1 + $0x170] ss:$8 sps:$4 sm:$0xff]   ;;  %v1270_v6 = vld [vmem:[%s1961_s1 + $0x64] ss:$8 sps:$4 sm:$0xff]   ;;  %v38_v50 = vpack.c.bf16 %v31_v48, %v31_v48 }
   0x5   :  { %649 = vmatpush1.bf16.msra.mxu0 %v1266_v2  ;;  %v1272_v7 = vld [vmem:[%s1961_s1 + $0x60] ss:$8 sps:$4 sm:$0xff]   ;;  %689 = vmatprep.subr.bf16.mxu1 %v1267_v4  ;;  %v1273_v8 = vld [vmem:[%s1961_s1 + $0x164] ss:$8 sps:$4 sm:$0xff]   ;;  %v1276_v10 = vld [vmem:[%s1961_s1 + $0x54] ss:$8 sps:$4 sm:$0xff]  }
   0x6   :  { %690 = vmatpush1.bf16.msra.mxu1 %v1269_v5  ;;  %650 = vmatprep.subr.bf16.mxu0 %v1270_v6  ;;  %v1275_v9 = vld [vmem:[%s1961_s1 + $0x160] ss:$8 sps:$4 sm:$0xff]   ;;  %v1278_v11 = vld [vmem:[%s1961_s1 + $0x50] ss:$8 sps:$4 sm:$0xff]   ;;  %v1279_v12 = vld [vmem:[%s1961_s1 + $0x154] ss:$8 sps:$4 sm:$0xff]  }
   0x7   :  { %691 = vmatprep.subr.bf16.mxu1 %v1273_v8  ;;  %v1282_v13 = vld [vmem:[%s1961_s1 + $0x44] ss:$8 sps:$4 sm:$0xff]   ;;  %v1281_v14 = vld [vmem:[%s1961_s1 + $0x150] ss:$8 sps:$4 sm:$0xff]   ;;  %v1284_v16 = vld [vmem:[%s1961_s1 + $0x40] ss:$8 sps:$4 sm:$0xff]   ;;  %680 = vmatprep.mubr.bf16.mxu0 %v38_v50 }
   0x8   :  { %v1285_v15 = vld [vmem:[%s1961_s1 + $0x144] ss:$8 sps:$4 sm:$0xff]   ;;  %v1288_v17 = vld [vmem:[%s1961_s1 + $0x34] ss:$8 sps:$4 sm:$0xff]   ;;  %v1287_v18 = vld [vmem:[%s1961_s1 + $0x140] ss:$8 sps:$4 sm:$0xff]  }
   0x9   :  { %651 = vmatpush1.bf16.msra.mxu0 %v1272_v7  ;;  %v1291_v19 = vld [vmem:[%s1961_s1 + $0x134] ss:$8 sps:$4 sm:$0xff]   ;;  %v1290_v20 = vld [vmem:[%s1961_s1 + $0x30] ss:$8 sps:$4 sm:$0xff]   ;;  %v1294_v21 = vld [vmem:[%s1961_s1 + $0x24] ss:$8 sps:$4 sm:$0xff]  }
   0xa   :  { %652 = vmatprep.subr.bf16.mxu0 %v1276_v10  ;;  %692 = vmatpush1.bf16.msra.mxu1 %v1275_v9  ;;  %v1293_v22 = vld [vmem:[%s1961_s1 + $0x130] ss:$8 sps:$4 sm:$0xff]   ;;  %v1297_v23 = vld [vmem:[%s1961_s1 + $0x124] ss:$8 sps:$4 sm:$0xff]   ;;  %v1296_v24 = vld [vmem:[%s1961_s1 + $0x20] ss:$8 sps:$4 sm:$0xff]  }
   0xb   :  { %693 = vmatprep.subr.bf16.mxu1 %v1279_v12  ;;  %v1300_v25 = vld [vmem:[%s1961_s1 + $0x14] ss:$8 sps:$4 sm:$0xff]   ;;  %v1299_v26 = vld [vmem:[%s1961_s1 + $0x120] ss:$8 sps:$4 sm:$0xff]   ;;  %v1302_v28 = vld [vmem:[%s1961_s1 + $0x10] ss:$8 sps:$4 sm:$0xff]  }
   0xc   :  { %v1303_v27 = vld [vmem:[%s1961_s1 + $0x114] ss:$8 sps:$4 sm:$0xff]   ;;  %v1306_v29 = vld [vmem:[%s1961_s1 + $0x4] ss:$8 sps:$4 sm:$0xff]   ;;  %v1305_v30 = vld [vmem:[%s1961_s1 + $0x110] ss:$8 sps:$4 sm:$0xff]  }
   0xd   :  { %653 = vmatpush1.bf16.msra.mxu0 %v1278_v11  ;;  %v1309_v31 = vld [vmem:[%s1961_s1 + $0x104] ss:$8 sps:$4 sm:$0xff]   ;;  %v1308_v32 = vld [vmem:[%s1961_s1] ss:$8 sps:$4 sm:$0xff]   ;;  %v1312_v33 = vld [vmem:[%s1961_s1 + $0xf4] ss:$8 sps:$4 sm:$0xff]  }
   0xe   :  { %654 = vmatprep.subr.bf16.mxu0 %v1282_v13  ;;  %694 = vmatpush1.bf16.msra.mxu1 %v1281_v14  ;;  %v1311_v34 = vld [vmem:[%s1961_s1 + $0x100] ss:$8 sps:$4 sm:$0xff]   ;;  %v1315_v35 = vld [vmem:[%s1961_s1 + $0x1f4] ss:$8 sps:$4 sm:$0xff]   ;;  %v1314_v36 = vld [vmem:[%s1961_s1 + $0xf0] ss:$8 sps:$4 sm:$0xff]  }
   0xf   :  { %695 = vmatprep.subr.bf16.mxu1 %v1285_v15  ;;  %v1318_v37 = vld [vmem:[%s1961_s1 + $0xe4] ss:$8 sps:$4 sm:$0xff]   ;;  %v1317_v38 = vld [vmem:[%s1961_s1 + $0x1f0] ss:$8 sps:$4 sm:$0xff]   ;;  %v1320_v40 = vld [vmem:[%s1961_s1 + $0xe0] ss:$8 sps:$4 sm:$0xff]  }
  0x10   :  { %v1321_v39 = vld [vmem:[%s1961_s1 + $0x1e4] ss:$8 sps:$4 sm:$0xff]   ;;  %v1324_v41 = vld [vmem:[%s1961_s1 + $0xd4] ss:$8 sps:$4 sm:$0xff]   ;;  %v1323_v42 = vld [vmem:[%s1961_s1 + $0x1e0] ss:$8 sps:$4 sm:$0xff]  }
  0x11   :  { %655 = vmatpush1.bf16.msra.mxu0 %v1284_v16  ;;  %v1327_v43 = vld [vmem:[%s1961_s1 + $0x1d4] ss:$8 sps:$4 sm:$0xff]   ;;  %v1326_v44 = vld [vmem:[%s1961_s1 + $0xd0] ss:$8 sps:$4 sm:$0xff]   ;;  %v1330_v45 = vld [vmem:[%s1961_s1 + $0xc4] ss:$8 sps:$4 sm:$0xff]  }
  0x12   :  { %656 = vmatprep.subr.bf16.mxu0 %v1288_v17  ;;  %696 = vmatpush1.bf16.msra.mxu1 %v1287_v18  ;;  %v1329_v46 = vld [vmem:[%s1961_s1 + $0x1d0] ss:$8 sps:$4 sm:$0xff]   ;;  %v1333_v47 = vld [vmem:[%s1961_s1 + $0x1c4] ss:$8 sps:$4 sm:$0xff]   ;;  %v1332_v49 = vld [vmem:[%s1961_s1 + $0xc0] ss:$8 sps:$4 sm:$0xff]  }
  0x13   :  { %697 = vmatprep.subr.bf16.mxu1 %v1291_v19  ;;  %v1336_v51 = vld [vmem:[%s1961_s1 + $0xb4] ss:$8 sps:$4 sm:$0xff]   ;;  %v1335_v53 = vld [vmem:[%s1961_s1 + $0x1c0] ss:$8 sps:$4 sm:$0xff]   ;;  %v1338_v56 = vld [vmem:[%s1961_s1 + $0xb0] ss:$8 sps:$4 sm:$0xff]  }
  0x14   :  { %v33_v52 = vld [vmem:[%s1960_s0 + $0x18] sm:$0xff]  ;;  %v1342_v57 = vld [vmem:[%s1961_s1 + $0xa4] ss:$8 sps:$4 sm:$0xff]   ;;  %v1344_v60 = vld [vmem:[%s1961_s1 + $0xa0] ss:$8 sps:$4 sm:$0xff]   ;;  %vm644_vm0 = vcmask 130048  }
  0x15   :  { %657 = vmatpush1.bf16.msra.mxu0 %v1290_v20  ;;  %v40_v54 = vpack.c.bf16 %v33_v52, %v33_v52  ;;  %v1339_v55 = vld [vmem:[%s1961_s1 + $0x1b4] ss:$8 sps:$4 sm:$0xff]   ;;  %v1341_v58 = vld [vmem:[%s1961_s1 + $0x1b0] ss:$8 sps:$4 sm:$0xff]   ;;  %v1345_v59 = vld [vmem:[%s1961_s1 + $0x1a4] ss:$8 sps:$4 sm:$0xff]  }
  0x16   :  { %658 = vmatprep.subr.bf16.mxu0 %v1294_v21  ;;  %698 = vmatpush1.bf16.msra.mxu1 %v1293_v22  ;;  %v1348_v61 = vld [vmem:[%s1961_s1 + $0x94] ss:$8 sps:$4 sm:$0xff]   ;;  %v1347_v62 = vld [vmem:[%s1961_s1 + $0x1a0] ss:$8 sps:$4 sm:$0xff]   ;;  %v1350_v0 = vld [vmem:[%s1961_s1 + $0x90] ss:$8 sps:$4 sm:$0xff]  }
  0x17   :  { %699 = vmatprep.subr.bf16.mxu1 %v1297_v23  ;;  %721 = vmatprep.mubr.bf16.mxu1 %v40_v54  ;;  %v1351_v63 = vld [vmem:[%s1961_s1 + $0x194] ss:$8 sps:$4 sm:$0xff]   ;;  %v1354_v1 = vld [vmem:[%s1961_s1 + $0x84] ss:$8 sps:$4 sm:$0xff]   ;;  %v1353_v2 = vld [vmem:[%s1961_s1 + $0x190] ss:$8 sps:$4 sm:$0xff]  }
  0x18   :  { %v1356_v4 = vld [vmem:[%s1961_s1 + $0x80] ss:$8 sps:$4 sm:$0xff]   ;;  %v1357_v5 = vld [vmem:[%s1961_s1 + $0x184] ss:$8 sps:$4 sm:$0xff]   ;;  %v1362_v8 = vld [vmem:[%s1961_s1 + $0x274] ss:$8 sps:$4 sm:$0xff]  }
  0x19   :  { %659 = vmatpush1.bf16.msra.mxu0 %v1296_v24  ;;  %v1359_v6 = vld [vmem:[%s1961_s1 + $0x180] ss:$8 sps:$4 sm:$0xff]   ;;  %v32_v9 = vld [vmem:[%s1960_s0 + $0x10] sm:$0xff]  ;;  %v1365_v12 = vld [vmem:[%s1961_s1 + $0x264] ss:$8 sps:$4 sm:$0xff]  }
  0x1a   :  { %660 = vmatprep.subr.bf16.mxu0 %v1300_v25  ;;  %700 = vmatpush1.bf16.msra.mxu1 %v1299_v26  ;;  %v30_v7 = vld [vmem:[%s1960_s0] sm:$0xff]  ;;  %v1360_v11 = vld [vmem:[%s1961_s1 + $0x270] ss:$8 sps:$4 sm:$0xff]   ;;  %v39_v13 = vpack.c.bf16 %v32_v9, %v32_v9  ;;  %v1368_v17 = vld [vmem:[%s1961_s1 + $0x254] ss:$8 sps:$4 sm:$0xff]  }
  0x1b   :  { %701 = vmatprep.subr.bf16.mxu1 %v1303_v27  ;;  %v37_v10 = vpack.c.bf16 %v30_v7, %v30_v7  ;;  %v1405_v14 = vld [vmem:[%s1961_s1 + $0x300] ss:$8 sps:$4 sm:$0xff]   ;;  %v1407_v15 = vld [vmem:[%s1961_s1 + $0x304] ss:$8 sps:$4 sm:$0xff]   ;;  %v36_v18 = vld [vmem:[%s1960_s0 + $0x30] sm:$0xff] }
  0x1c   :  { %v1363_v16 = vld [vmem:[%s1961_s1 + $0x260] ss:$8 sps:$4 sm:$0xff]   ;;  %v1366_v21 = vld [vmem:[%s1961_s1 + $0x250] ss:$8 sps:$4 sm:$0xff]   ;;  %v1371_v22 = vld [vmem:[%s1961_s1 + $0x244] ss:$8 sps:$4 sm:$0xff]   ;;  %v43_v23 = vpack.c.bf16 %v36_v18, %v36_v18 }
  0x1d   :  { %661 = vmatpush1.bf16.msra.mxu0 %v1302_v28  ;;  %v35_v19 = vld [vmem:[%s1960_s0 + $0x28] sm:$0xff]  ;;  %v1374_v25 = vld [vmem:[%s1961_s1 + $0x234] ss:$8 sps:$4 sm:$0xff]  }
  0x1e   :  { %662 = vmatprep.subr.bf16.mxu0 %v1306_v29  ;;  %702 = vmatpush1.bf16.msra.mxu1 %v1305_v30  ;;  %v42_v20 = vpack.c.bf16 %v35_v19, %v35_v19  ;;  %v1369_v24 = vld [vmem:[%s1961_s1 + $0x240] ss:$8 sps:$4 sm:$0xff]  }
  0x1f   :  { %703 = vmatprep.subr.bf16.mxu1 %v1309_v31 }
  0x21   :  { %663 = vmatpush1.bf16.msra.mxu0 %v1308_v32 }
  0x22   :  { %664 = vmatprep.subr.bf16.mxu0 %v1312_v33  ;;  %704 = vmatpush1.bf16.msra.mxu1 %v1311_v34 }
  0x23   :  { %705 = vmatprep.subr.bf16.mxu1 %v1315_v35 }
  0x25   :  { %665 = vmatpush2.bf16.msra.mxu0 %v1314_v36 }
  0x26   :  { %666 = vmatprep.subr.bf16.mxu0 %v1318_v37  ;;  %706 = vmatpush2.bf16.msra.mxu1 %v1317_v38 }
  0x27   :  { %707 = vmatprep.subr.bf16.mxu1 %v1321_v39 }
  0x29   :  { %667 = vmatpush2.bf16.msra.mxu0 %v1320_v40 }
  0x2a   :  { %668 = vmatprep.subr.bf16.mxu0 %v1324_v41  ;;  %708 = vmatpush2.bf16.msra.mxu1 %v1323_v42 }
  0x2b   :  { %709 = vmatprep.subr.bf16.mxu1 %v1327_v43 }
  0x2d   :  { %669 = vmatpush2.bf16.msra.mxu0 %v1326_v44 }
  0x2e   :  { %670 = vmatprep.subr.bf16.mxu0 %v1330_v45  ;;  %710 = vmatpush2.bf16.msra.mxu1 %v1329_v46 }
  0x2f   :  { %711 = vmatprep.subr.bf16.mxu1 %v1333_v47 }
  0x31   :  { %671 = vmatpush2.bf16.msra.mxu0 %v1332_v49 }
  0x32   :  { %672 = vmatprep.subr.bf16.mxu0 %v1336_v51  ;;  %712 = vmatpush2.bf16.msra.mxu1 %v1335_v53 }
  0x33   :  { %713 = vmatprep.subr.bf16.mxu1 %v1339_v55 }
  0x35   :  { %673 = vmatpush2.bf16.msra.mxu0 %v1338_v56 }
  0x36   :  { %674 = vmatprep.subr.bf16.mxu0 %v1342_v57  ;;  %714 = vmatpush2.bf16.msra.mxu1 %v1341_v58 }
  0x37   :  { %715 = vmatprep.subr.bf16.mxu1 %v1345_v59 }
  0x39   :  { %675 = vmatpush2.bf16.msra.mxu0 %v1344_v60 }
  0x3a   :  { %676 = vmatprep.subr.bf16.mxu0 %v1348_v61  ;;  %716 = vmatpush2.bf16.msra.mxu1 %v1347_v62 }
  0x3b   :  { %717 = vmatprep.subr.bf16.mxu1 %v1351_v63 }
  0x3d   :  { %677 = vmatpush2.bf16.msra.mxu0 %v1350_v0 }
  0x3e   :  { %678 = vmatprep.subr.bf16.mxu0 %v1354_v1  ;;  %718 = vmatpush2.bf16.msra.mxu1 %v1353_v2 }
  0x3f   :  { %719 = vmatprep.subr.bf16.mxu1 %v1357_v5 }
  0x41   :  { %679 = vmatpush2.bf16.msra.mxu0 %v1356_v4 }
  0x42   :  { %730 = vmatprep.subr.bf16.mxu0 %v1362_v8  ;;  %720 = vmatpush2.bf16.msra.mxu1 %v1359_v6 }
  0x43   :  { %785 = vmatprep.subr.bf16.mxu1 %v1407_v15 }
  0x44   :  { %681 = vmatmul.mubr.bf16.vlgmr.msra.gmra.mxu0 %v37_v10 }
  0x45   :  { %731 = vmatpush1.bf16.msra.mxu0 %v1360_v11  ;;  %722 = vmatmul.mubr.bf16.vlgmr.msra.gmra.mxu1 %v39_v13 }
  0x46   :  { %732 = vmatprep.subr.bf16.mxu0 %v1365_v12  ;;  %786 = vmatpush1.bf16.msra.mxu1 %v1405_v14 }
  0x47   :  { %803 = vmatprep.mubr.bf16.mxu1 %v1485_v3  ;;  %762 = vmatprep.mubr.bf16.mxu0 %v42_v20 }
  0x49   :  { %733 = vmatpush1.bf16.msra.mxu0 %v1363_v16 }
  0x4a   :  { %734 = vmatprep.subr.bf16.mxu0 %v1368_v17 }
  0x4d   :  { %735 = vmatpush1.bf16.msra.mxu0 %v1366_v21  ;;  %1227 = vmatmul.mubr.msk.bf16.vlgmr.msra.gmra.mxu1 %vm644_vm0, %v43_v23 }
  0x4e   :  { %736 = vmatprep.subr.bf16.mxu0 %v1371_v22 }
  0x4f   :  { %14 = vsyncpa [#allocation4], 0  ;;  %v1372_v3 = vld [vmem:[%s1961_s1 + $0x230] ss:$8 sps:$4 sm:$0xff]   ;;  %v1377_v26 = vld [vmem:[%s1961_s1 + $0x224] ss:$8 sps:$4 sm:$0xff]  }
  0x50   :  { %v1375_v27 = vld [vmem:[%s1961_s1 + $0x220] ss:$8 sps:$4 sm:$0xff]   ;;  %v1380_v28 = vld [vmem:[%s1961_s1 + $0x214] ss:$8 sps:$4 sm:$0xff]   ;;  %v1378_v29 = vld [vmem:[%s1961_s1 + $0x210] ss:$8 sps:$4 sm:$0xff]  }
  0x51   :  { %737 = vmatpush1.bf16.msra.mxu0 %v1369_v24  ;;  %v1383_v30 = vld [vmem:[%s1961_s1 + $0x204] ss:$8 sps:$4 sm:$0xff]   ;;  %v1381_v31 = vld [vmem:[%s1961_s1 + $0x200] ss:$8 sps:$4 sm:$0xff]   ;;  %v1386_v32 = vld [vmem:[%s1961_s1 + $0x2f4] ss:$8 sps:$4 sm:$0xff]  }
  0x52   :  { %738 = vmatprep.subr.bf16.mxu0 %v1374_v25  ;;  %v1384_v33 = vld [vmem:[%s1961_s1 + $0x2f0] ss:$8 sps:$4 sm:$0xff]   ;;  %v1389_v34 = vld [vmem:[%s1961_s1 + $0x2e4] ss:$8 sps:$4 sm:$0xff]   ;;  %v1387_v35 = vld [vmem:[%s1961_s1 + $0x2e0] ss:$8 sps:$4 sm:$0xff]  }
  0x53   :  { %v1392_v36 = vld [vmem:[%s1961_s1 + $0x2d4] ss:$8 sps:$4 sm:$0xff]   ;;  %v1390_v37 = vld [vmem:[%s1961_s1 + $0x2d0] ss:$8 sps:$4 sm:$0xff]   ;;  %v1395_v38 = vld [vmem:[%s1961_s1 + $0x2c4] ss:$8 sps:$4 sm:$0xff]  }
  0x54   :  { %v1393_v39 = vld [vmem:[%s1961_s1 + $0x2c0] ss:$8 sps:$4 sm:$0xff]   ;;  %v1398_v40 = vld [vmem:[%s1961_s1 + $0x2b4] ss:$8 sps:$4 sm:$0xff]   ;;  %v1396_v41 = vld [vmem:[%s1961_s1 + $0x2b0] ss:$8 sps:$4 sm:$0xff]  }
  0x55   :  { %739 = vmatpush1.bf16.msra.mxu0 %v1372_v3  ;;  %v1401_v42 = vld [vmem:[%s1961_s1 + $0x2a4] ss:$8 sps:$4 sm:$0xff]   ;;  %v1399_v43 = vld [vmem:[%s1961_s1 + $0x2a0] ss:$8 sps:$4 sm:$0xff]   ;;  %v1404_v44 = vld [vmem:[%s1961_s1 + $0x294] ss:$8 sps:$4 sm:$0xff]  }
  0x56   :  { %740 = vmatprep.subr.bf16.mxu0 %v1377_v26  ;;  %v1402_v45 = vld [vmem:[%s1961_s1 + $0x290] ss:$8 sps:$4 sm:$0xff]   ;;  %v1410_v46 = vld [vmem:[%s1961_s1 + $0x284] ss:$8 sps:$4 sm:$0xff]   ;;  %v1408_v47 = vld [vmem:[%s1961_s1 + $0x280] ss:$8 sps:$4 sm:$0xff]  }
  0x57   :  { %v34_v48 = vld [vmem:[%s1960_s0 + $0x20] sm:$0xff]  ;;  %v1411_v50 = vld [vmem:[%s1963_s3 + $0x70] ss:$8 sps:$4 sm:$0xff]   ;;  %v1413_v51 = vld [vmem:[%s1963_s3 + $0x74] ss:$8 sps:$4 sm:$0xff]   ;;  %vm1113_vm5 = vcmask 57344  }
  0x58   :  { %v41_v49 = vpack.c.bf16 %v34_v48, %v34_v48  ;;  %v1416_v52 = vld [vmem:[%s1963_s3 + $0x64] ss:$8 sps:$4 sm:$0xff]   ;;  %1024 = vmatprep.subr.bf16.mxu1 %v1413_v51  ;;  %v1414_v53 = vld [vmem:[%s1963_s3 + $0x60] ss:$8 sps:$4 sm:$0xff]   ;;  %v1419_v54 = vld [vmem:[%s1963_s3 + $0x54] ss:$8 sps:$4 sm:$0xff]  }
  0x59   :  { %741 = vmatpush1.bf16.msra.mxu0 %v1375_v27  ;;  %1025 = vmatpush1.bf16.msra.mxu1 %v1411_v50  ;;  %v1417_v55 = vld [vmem:[%s1963_s3 + $0x50] ss:$8 sps:$4 sm:$0xff]   ;;  %v1422_v56 = vld [vmem:[%s1963_s3 + $0x44] ss:$8 sps:$4 sm:$0xff]   ;;  %v1420_v57 = vld [vmem:[%s1963_s3 + $0x40] ss:$8 sps:$4 sm:$0xff]  }
  0x5a   :  { %742 = vmatprep.subr.bf16.mxu0 %v1380_v28  ;;  %1026 = vmatprep.subr.bf16.mxu1 %v1416_v52  ;;  %v1425_v58 = vld [vmem:[%s1963_s3 + $0x34] ss:$8 sps:$4 sm:$0xff]   ;;  %v1423_v59 = vld [vmem:[%s1963_s3 + $0x30] ss:$8 sps:$4 sm:$0xff]   ;;  %v1428_v60 = vld [vmem:[%s1963_s3 + $0x24] ss:$8 sps:$4 sm:$0xff]  }
  0x5b   :  { %v1426_v61 = vld [vmem:[%s1963_s3 + $0x20] ss:$8 sps:$4 sm:$0xff]   ;;  %v1431_v62 = vld [vmem:[%s1963_s3 + $0x14] ss:$8 sps:$4 sm:$0xff]   ;;  %v1429_v63 = vld [vmem:[%s1963_s3 + $0x10] ss:$8 sps:$4 sm:$0xff]  }
  0x5c   :  { %v1434_v0 = vld [vmem:[%s1963_s3 + $0x4] ss:$8 sps:$4 sm:$0xff]   ;;  %v1432_v1 = vld [vmem:[%s1963_s3] ss:$8 sps:$4 sm:$0xff]   ;;  %v1437_v2 = vld [vmem:[%s1963_s3 + $0xf4] ss:$8 sps:$4 sm:$0xff]  }
  0x5d   :  { %743 = vmatpush1.bf16.msra.mxu0 %v1378_v29  ;;  %1027 = vmatpush1.bf16.msra.mxu1 %v1414_v53  ;;  %v1435_v4 = vld [vmem:[%s1963_s3 + $0xf0] ss:$8 sps:$4 sm:$0xff]   ;;  %v1440_v5 = vld [vmem:[%s1963_s3 + $0xe4] ss:$8 sps:$4 sm:$0xff]   ;;  %v1438_v6 = vld [vmem:[%s1963_s3 + $0xe0] ss:$8 sps:$4 sm:$0xff]  }
  0x5e   :  { %744 = vmatprep.subr.bf16.mxu0 %v1383_v30  ;;  %1028 = vmatprep.subr.bf16.mxu1 %v1419_v54  ;;  %v1443_v7 = vld [vmem:[%s1963_s3 + $0xd4] ss:$8 sps:$4 sm:$0xff]   ;;  %v1441_v8 = vld [vmem:[%s1963_s3 + $0xd0] ss:$8 sps:$4 sm:$0xff]   ;;  %v1446_v9 = vld [vmem:[%s1963_s3 + $0xc4] ss:$8 sps:$4 sm:$0xff]   ;;  %v144_v30 = vlaneseq }
  0x5f   :  { %v1444_v10 = vld [vmem:[%s1963_s3 + $0xc0] ss:$8 sps:$4 sm:$0xff]   ;;  %v1449_v11 = vld [vmem:[%s1963_s3 + $0xb4] ss:$8 sps:$4 sm:$0xff]   ;;  %v1447_v12 = vld [vmem:[%s1963_s3 + $0xb0] ss:$8 sps:$4 sm:$0xff]  }
  0x60   :  { %v1452_v13 = vld [vmem:[%s1963_s3 + $0xa4] ss:$8 sps:$4 sm:$0xff]   ;;  %v1450_v14 = vld [vmem:[%s1963_s3 + $0xa0] ss:$8 sps:$4 sm:$0xff]   ;;  %v1455_v15 = vld [vmem:[%s1963_s3 + $0x94] ss:$8 sps:$4 sm:$0xff]  }
  0x61   :  { %745 = vmatpush1.bf16.msra.mxu0 %v1381_v31  ;;  %1029 = vmatpush1.bf16.msra.mxu1 %v1417_v55  ;;  %v1453_v16 = vld [vmem:[%s1963_s3 + $0x90] ss:$8 sps:$4 sm:$0xff]   ;;  %v1458_v17 = vld [vmem:[%s1963_s3 + $0x84] ss:$8 sps:$4 sm:$0xff]   ;;  %v1456_v18 = vld [vmem:[%s1963_s3 + $0x80] ss:$8 sps:$4 sm:$0xff]  }
  0x62   :  { %746 = vmatprep.subr.bf16.mxu0 %v1386_v32  ;;  %1030 = vmatprep.subr.bf16.mxu1 %v1422_v56  ;;  %v1943_v31 = vshrl.u32 %v144_v30, 7  ;;  %v852_v55 = vld [vmem:[%s1964_s4] sm:$0x3]  ;;  %s1486_s4 = smov [#allocation3]  }
  0x64   :  { %v146_v32 = vsub.s32 0, %v1943_v31 }
  0x65   :  { %747 = vmatpush2.bf16.msra.mxu0 %v1384_v33  ;;  %1031 = vmatpush1.bf16.msra.mxu1 %v1420_v57  ;;  %v142_v33 = vld [vmem:[%s1962_s2] sm:$0x3] }
  0x66   :  { %748 = vmatprep.subr.bf16.mxu0 %v1389_v34  ;;  %1032 = vmatprep.subr.bf16.mxu1 %v1425_v58  ;;  %v150_v34 = vsub.s32 1, %v1943_v31  ;;  %v857_v56 = vrot.slane %v852_v55, %v146_v32 }
  0x68   :  { %v861_v57 = vrot.slane %v852_v55, %v150_v34 }
  0x69   :  { %749 = vmatpush2.bf16.msra.mxu0 %v1387_v35  ;;  %1033 = vmatpush1.bf16.msra.mxu1 %v1423_v59  ;;  %v147_v35 = vrot.slane %v142_v33, %v146_v32 }
  0x6a   :  { %750 = vmatprep.subr.bf16.mxu0 %v1392_v36  ;;  %1034 = vmatprep.subr.bf16.mxu1 %v1428_v60  ;;  %v151_v36 = vrot.slane %v142_v33, %v150_v34  ;;  %v1071_v60 = vld [vmem:[%s1965_s5] sm:$0x3]  ;;  %s1121_s5 = sshll.u32 %s1486_s4, 4  ;;  %s1122_s5 = int_to_ptr.vmem [resolvable:$true] %s1121_s5 }
  0x6b   :  { %s1463_s6 = scalar_lea.vmem %s1122_s5, 16  ;;  %s1467_s11 = scalar_lea.vmem %s1122_s5, 32 }
  0x6c   :  { %p1464_p0 = scmp.ne.s32.totalorder %s1122_s5, %s1463_s6  ;;  %p1468_p1 = scmp.lt.s32.totalorder %s1122_s5, %s1122_s5 }
  0x6d   :  { %751 = vmatpush2.bf16.msra.mxu0 %v1390_v37  ;;  %1035 = vmatpush1.bf16.msra.mxu1 %v1426_v61  ;;  %p1469_p2 = scmp.lt.s32.totalorder %s1467_s11, %s1463_s6 }
  0x6e   :  { %752 = vmatprep.subr.bf16.mxu0 %v1395_v38  ;;  %1036 = vmatprep.subr.bf16.mxu1 %v1431_v62 }
  0x6f   :  { %p1470_p3 = por %p1469_p2, %p1468_p1 }
  0x71   :  { %753 = vmatpush2.bf16.msra.mxu0 %v1393_v39  ;;  %1037 = vmatpush1.bf16.msra.mxu1 %v1429_v63  ;;  %p1471_p4 = pnand %p1470_p3, %p1464_p0 }
  0x72   :  { %754 = vmatprep.subr.bf16.mxu0 %v1398_v40  ;;  %1038 = vmatprep.subr.bf16.mxu1 %v1434_v0 }
  0x75   :  { %755 = vmatpush2.bf16.msra.mxu0 %v1396_v41  ;;  %1039 = vmatpush1.bf16.msra.mxu1 %v1432_v1  ;;  %v1076_v1 = vrot.slane %v1071_v60, %v146_v32 }
  0x76   :  { %756 = vmatprep.subr.bf16.mxu0 %v1401_v42  ;;  %1040 = vmatprep.subr.bf16.mxu1 %v1437_v2  ;;  %v1080_v2 = vrot.slane %v1071_v60, %v150_v34 }
  0x79   :  { %757 = vmatpush2.bf16.msra.mxu0 %v1399_v43  ;;  %1041 = vmatpush2.bf16.msra.mxu1 %v1435_v4 }
  0x7a   :  { %758 = vmatprep.subr.bf16.mxu0 %v1404_v44  ;;  %1042 = vmatprep.subr.bf16.mxu1 %v1440_v5 }
  0x7d   :  { %759 = vmatpush2.bf16.msra.mxu0 %v1402_v45  ;;  %1043 = vmatpush2.bf16.msra.mxu1 %v1438_v6 }
  0x7e   :  { %760 = vmatprep.subr.bf16.mxu0 %v1410_v46  ;;  %1044 = vmatprep.subr.bf16.mxu1 %v1443_v7 }
  0x81   :  { %761 = vmatpush2.bf16.msra.mxu0 %v1408_v47  ;;  %1045 = vmatpush2.bf16.msra.mxu1 %v1441_v8 }
  0x82   :  { %1046 = vmatprep.subr.bf16.mxu1 %v1446_v9 }
  0x84   :  { %763 = vmatmul.mubr.bf16.vlgmr.msra.gmra.mxu0 %v41_v49 }
  0x85   :  { %1047 = vmatpush2.bf16.msra.mxu1 %v1444_v10 }
  0x86   :  { %1048 = vmatprep.subr.bf16.mxu1 %v1449_v11  ;;  %v1088_v11 = vld [vmem:[#allocation2] sm:$0x1] }
  0x89   :  { %1049 = vmatpush2.bf16.msra.mxu1 %v1447_v12 }
  0x8a   :  { %1050 = vmatprep.subr.bf16.mxu1 %v1452_v13 }
  0x8d   :  { %1051 = vmatpush2.bf16.msra.mxu1 %v1450_v14 }
  0x8e   :  { %1052 = vmatprep.subr.bf16.mxu1 %v1455_v15 }
  0x91   :  { %1053 = vmatpush2.bf16.msra.mxu1 %v1453_v16 }
  0x92   :  { %1054 = vmatprep.subr.bf16.mxu1 %v1458_v17 }
  0x95   :  { %1055 = vmatpush2.bf16.msra.mxu1 %v1456_v18 }
 0x104   :  { %v682_v19 = vpop.f32.mrf.mxu0 }
 0x105   :  { %v723_v21 = vpop.f32.mrf.mxu1  ;;  %v683_v37 = vadd.f32 %v682_v19, %v147_v35  ;;  %v1107_v19 = vand.u32 127, %v144_v30 }
 0x106   :  { %v684_v20 = vpop.f32.mrf.mxu0 }
 0x107   :  { %v725_v23 = vpop.f32.mrf.mxu1  ;;  %v685_v38 = vadd.f32 %v684_v20, %v151_v36  ;;  %v724_v39 = vadd.f32 %v723_v21, %v683_v37  ;;  %v1110_v20 = vsub.s32 %v1107_v19, %v1943_v31 }
 0x108   :  { %v686_v22 = vpop.f32.mrf.mxu0 }
 0x109   :  { %v727_v25 = vpop.f32.mrf.mxu1  ;;  %v726_v41 = vadd.f32 %v725_v23, %v685_v38 }
 0x10a   :  { %v687_v24 = vpop.f32.mrf.mxu0 }
 0x10b   :  { %v728_v3 = vpop.f32.mrf.mxu1 }
 0x10d   :  { %v805_v26 = vpop.f32.mrf.mxu1 }
 0x10f   :  { %v807_v27 = vpop.f32.mrf.mxu1 }
 0x111   :  { %v809_v28 = vpop.f32.mrf.mxu1 }
 0x113   :  { %v810_v29 = vpop.f32.mrf.mxu1 }
 0x144   :  { %v764_v40 = vpop.f32.mrf.mxu0 }
 0x145   :  { %v765_v42 = vadd.f32 %v764_v40, %v724_v39 }
 0x146   :  { %v766_v43 = vpop.f32.mrf.mxu0 }
 0x147   :  { %v806_v44 = vadd.f32 %v805_v26, %v765_v42  ;;  %v767_v45 = vadd.f32 %v766_v43, %v726_v41 }
 0x148   :  { %v768_v46 = vpop.f32.mrf.mxu0 }
 0x149   :  { %vm812_vm1 = vcmp.gt.f32.partialorder %v806_v44, 0.0  ;;  %v814_v47 = vmul.f32 0.01, %v806_v44  ;;  %v808_v48 = vadd.f32 %v807_v27, %v767_v45 }
 0x14a   :  { %v769_v49 = vpop.f32.mrf.mxu0 }
 0x14b   :  { %v815_v50 = vmul.f32 0.01, %v808_v48  ;;  %vm813_vm2 = vcmp.gt.f32.partialorder %v808_v48, 0.0  ;;  %v816_v51 = vsel %vm812_vm1, %v806_v44, %v814_v47 }
 0x14c   :  { %v818_v54 = vpack.c.bf16 %v816_v51, %v816_v51 }
 0x14d   :  { %v817_v52 = vsel %vm813_vm2, %v808_v48, %v815_v50 }
 0x14e   :  { %v819_v53 = vpack.c.bf16 %v817_v52, %v817_v52 }
 0x150   :  { %1056 = vmatprep.mubr.bf16.mxu1 %v819_v53 }
 0x151   :  { %1057 = vmatmul.mubr.bf16.vlgmr.msra.gmra.mxu1 %v818_v54 }
 0x211   :  { %v1058_v58 = vpop.f32.mrf.mxu1 }
 0x212   :  { %v1059_v59 = vadd.f32 %v1058_v58, %v857_v56 }
 0x213   :  { %v1060_v61 = vpop.f32.mrf.mxu1 }
 0x214   :  { %vm1065_vm3 = vcmp.gt.f32.partialorder %v1059_v59, 0.0  ;;  %v1067_v62 = vmul.f32 0.01, %v1059_v59  ;;  %v1061_v63 = vadd.f32 %v1060_v61, %v861_v57 }
 0x215   :  { %v1062_v0 = vpop.f32.mrf.mxu1 }
 0x216   :  { %vm1066_vm4 = vcmp.gt.f32.partialorder %v1061_v63, 0.0  ;;  %v1068_v4 = vmul.f32 0.01, %v1061_v63  ;;  %v1069_v5 = vsel %vm1065_vm3, %v1059_v59, %v1067_v62 }
 0x217   :  { %v1063_v6 = vpop.f32.mrf.mxu1  ;;  %v1083_v8 = vmul.f32 %v1076_v1, %v1069_v5 }
 0x218   :  { %v1070_v7 = vsel %vm1066_vm4, %v1061_v63, %v1068_v4 }
 0x219   :  { %v1084_v9 = vmul.f32 %v1080_v2, %v1070_v7 }
 0x21b   :  { %v1085_v10 = vadd.f32 %v1084_v9, %v1083_v8 }
 0x21d   :  { %1086 = vadd.xlane.f32.xlu0 %v1085_v10 }
 0x233   :  { %1091 = vperm.xlu0 %1263, %v1088_v11  }
 0x2a6   :  { %v1087_v12 = vpop.xlane.xlu0 %1086 }
 0x2ae   :  { %v1092_v13 = vpop.permute.xlu0 %1091 }
 0x2af   :  { %v1097_v14 = vrot.slane %v1092_v13, %v146_v32 }
 0x2b1   :  { %v1098_v15 = vadd.f32 %v1097_v14, %v1087_v12 }
 0x2b3   :  { %v1260_v16 = vmul.f32 -1.442695, %v1098_v15 }
 0x2b5   :  { %1459 = vpow2.f32 %v1260_v16 }
 0x2c2   :  { %v1460_v17 = vpop.eup %1459 }
 0x2c3   :  { %v1102_v18 = vadd.f32 1.0, %v1460_v17 }
 0x2c5   :  { %1461 = vrcp.f32 %v1102_v18 }
 0x2d2   :  { %v1462_v21 = vpop.eup %1461 }
 0x2d3   :  { %v1111_v22 = vrot.slane %v1462_v21, %v1110_v20 }
 0x2d5   :  { %1114 = vst.msk [vmem:[#allocation3] sm:$0x1] %vm1113_vm5, %v1111_v22 }
 0x2d6   :  { %1474 = shalt.err (!%p1471_p4)
}
 0x2d7   :  { %1124 = dma.vmem_to_hbm [thread:$0]  %s1122_s5, 16, %s1967_s7, [#allocation4]  }
 0x2d8   :  { %1483 = dma.done.wait [#allocation4], 16  }
 0x2d9   :  { %1484 = vsyncadd [#allocation4], 4294967280 }
 0x2da   :  { %1128 = vsyncpa [#allocation4], 1 }

</bundles_post_ra>
